<compile_context>
chip_gen: v5e
topology: v5e:2x2
jax: 0.10.0
libtpu: 0.0.40
codegen_flags: <defaults>
</compile_context>

<pallas_src>
import jax
import jax.numpy as jnp
from jax.experimental import pallas as pl
from jax.experimental.pallas import tpu as pltpu

IN_DIM = 75
HID_DIM = 75
HID_PAD = 128          # hidden dim zero-padded to one full lane width
OUT_DIM = 2
NEG_SLOPE = 0.01       # PyTorch LeakyReLU default negative_slope


def mlp_kernel(x_ref, w1_ref, b1_ref, w2_ref, b2_ref, o_ref):
    # x: (TB, 75) bf16 | w1: (75, 128) bf16 | b1: (1, 128) f32
    # w2: (128, 2) bf16 | b2: (1, 2)  f32 | o: (TB, 2)  f32
    x = x_ref[...]
    # bf16 MXU matmul with f32 accumulation; bias + LeakyReLU in f32 on the VPU.
    h = jnp.dot(x, w1_ref[...], preferred_element_type=jnp.float32) + b1_ref[...]
    h = jnp.where(h >= 0, h, NEG_SLOPE * h)
    o = jnp.dot(h.astype(jnp.bfloat16), w2_ref[...],
                preferred_element_type=jnp.float32) + b2_ref[...]
    o_ref[...] = o.astype(o_ref.dtype)


def _round_up(n, m):
    return ((n + m - 1) // m) * m


def prepare_params(w1, b1, w2, b2):
    """Pad hidden dim 75 -> 128 (lane-dense) and cast matmul weights to bf16.

    Zero padding is exact: LeakyReLU(0 + 0) == 0 and padded w2 rows are zero,
    so padded lanes contribute nothing to the output.
    """
    w1p = jnp.zeros((IN_DIM, HID_PAD), jnp.float32).at[:, :HID_DIM].set(w1)
    b1p = jnp.zeros((1, HID_PAD), jnp.float32).at[:, :HID_DIM].set(b1)
    w2p = jnp.zeros((HID_PAD, OUT_DIM), jnp.float32).at[:HID_DIM, :].set(w2)
    return (w1p.astype(jnp.bfloat16), b1p,
            w2p.astype(jnp.bfloat16), b2.astype(jnp.float32))


def net_forward(x, w1p, b1p, w2p, b2p, *, block_b=512):
    """x: (B, 75) float32/bfloat16.  Returns (B, 2) float32."""
    B = x.shape[0]
    # Batch tile: multiple of 16 (bf16 sublane packing), capped at block_b.
    tb = min(block_b, _round_up(B, 16))
    padded_b = _round_up(B, tb)

    xb = x.astype(jnp.bfloat16)
    if padded_b != B:
        xb = jnp.pad(xb, ((0, padded_b - B), (0, 0)))

    out = pl.pallas_call(
        mlp_kernel,
        out_shape=jax.ShapeDtypeStruct((padded_b, OUT_DIM), jnp.float32),
        grid=(padded_b // tb,),
        in_specs=[
            pl.BlockSpec((tb, IN_DIM), lambda i: (i, 0)),        # x: batch-tiled
            pl.BlockSpec((IN_DIM, HID_PAD), lambda i: (0, 0)),   # w1: resident
            pl.BlockSpec((1, HID_PAD), lambda i: (0, 0)),        # b1: resident
            pl.BlockSpec((HID_PAD, OUT_DIM), lambda i: (0, 0)),  # w2: resident
            pl.BlockSpec((1, OUT_DIM), lambda i: (0, 0)),        # b2: resident
        ],
        out_specs=pl.BlockSpec((tb, OUT_DIM), lambda i: (i, 0)),
        compiler_params=pltpu.CompilerParams(
            dimension_semantics=("parallel",),                   # v7x megacore
        ),
    )(xb, w1p, b1p, w2p, b2p)

    return out[:B] if padded_b != B else out


def init_params(key):
    """Deterministic init mirroring nn.Linear's U(-1/sqrt(fan_in), 1/sqrt(fan_in))."""
    k1, k2, k3, k4 = jax.random.split(key, 4)
    bound1 = 1.0 / jnp.sqrt(jnp.float32(IN_DIM))
    bound2 = 1.0 / jnp.sqrt(jnp.float32(HID_DIM))
    # Stored as (in, out) == W_torch.T
    w1 = jax.random.uniform(k1, (IN_DIM, HID_DIM), jnp.float32, -bound1, bound1)
    b1 = jax.random.uniform(k2, (1, HID_DIM), jnp.float32, -bound1, bound1)
    w2 = jax.random.uniform(k3, (HID_DIM, OUT_DIM), jnp.float32, -bound2, bound2)
    b2 = jax.random.uniform(k4, (1, OUT_DIM), jnp.float32, -bound2, bound2)
    return w1, b1, w2, b2


def reference_forward_f32(x, w1, b1, w2, b2):
    """Pure f32 reference (original module semantics)."""
    h = x @ w1 + b1
    h = jnp.where(h >= 0, h, NEG_SLOPE * h)
    return h @ w2 + b2


def reference_forward_bf16(x, w1, b1, w2, b2):
    """Reference mirroring the kernel's dtype handling (bf16 matmul inputs, f32 accumulate)."""
    f32 = jnp.float32
    xb = x.astype(jnp.bfloat16).astype(f32)
    w1b = w1.astype(jnp.bfloat16).astype(f32)
    w2b = w2.astype(jnp.bfloat16).astype(f32)
    h = xb @ w1b + b1
    h = jnp.where(h >= 0, h, NEG_SLOPE * h)
    hb = h.astype(jnp.bfloat16).astype(f32)
    return hb @ w2b + b2


if __name__ == "__main__":
    key = jax.random.PRNGKey(0)
    kx1, kx2, kp = jax.random.split(key, 3)

    w1, b1, w2, b2 = init_params(kp)
    params = prepare_params(w1, b1, w2, b2)

    # Case 1: tiny batch (grid=1, no per-step overhead).
    x_small = jax.random.normal(kx1, (8, IN_DIM), jnp.float32)
    out_small = jax.block_until_ready(net_forward(x_small, *params))
    assert out_small.shape == (8, OUT_DIM)
    ref_small = reference_forward_bf16(x_small, w1, b1, w2, b2)
    assert jnp.allclose(out_small, ref_small, atol=1e-3, rtol=1e-3), \
        "mismatch vs bf16-mirrored reference (small batch)"
    assert jnp.allclose(out_small, reference_forward_f32(x_small, w1, b1, w2, b2),
                        atol=5e-2, rtol=5e-2), "mismatch vs f32 reference (small batch)"

    # Case 2: larger, ragged batch exercising the batch grid + padding path.
    x_big = jax.random.normal(kx2, (1000, IN_DIM), jnp.float32)
    out_big = jax.block_until_ready(net_forward(x_big, *params, block_b=256))
    assert out_big.shape == (1000, OUT_DIM)
    ref_big = reference_forward_bf16(x_big, w1, b1, w2, b2)
    assert jnp.allclose(out_big, ref_big, atol=1e-3, rtol=1e-3), \
        "mismatch vs bf16-mirrored reference (large batch)"

    print("KERNEL_OK")
</pallas_src>

<mosaic_0001>
module attributes {stable_mosaic.version = 11 : i64} {
  func.func @mlp_kernel(%arg0: i32, %arg1: memref<16x75xbf16, #tpu.memory_space<vmem>>, %arg2: memref<75x128xbf16, #tpu.memory_space<vmem>>, %arg3: memref<1x128xf32, #tpu.memory_space<vmem>>, %arg4: memref<128x2xbf16, #tpu.memory_space<vmem>>, %arg5: memref<1x2xf32, #tpu.memory_space<vmem>>, %arg6: memref<16x2xf32, #tpu.memory_space<vmem>>) attributes {dimension_semantics = [#tpu.dimension_semantics<parallel>], iteration_bounds = array<i64: 1>, scalar_prefetch = 0 : i64, scratch_operands = 0 : i64, tpu.core_type = #tpu.core_type<tc>, window_params = [{transform_indices = @transform_0, window_bounds = array<i64: 16, 75>}, {pipeline_mode = #tpu.pipeline_mode<synchronous>, transform_indices = @transform_1, window_bounds = array<i64: 75, 128>}, {pipeline_mode = #tpu.pipeline_mode<synchronous>, transform_indices = @transform_2, window_bounds = array<i64: 1, 128>}, {pipeline_mode = #tpu.pipeline_mode<synchronous>, transform_indices = @transform_3, window_bounds = array<i64: 128, 2>}, {pipeline_mode = #tpu.pipeline_mode<synchronous>, transform_indices = @transform_4, window_bounds = array<i64: 1, 2>}, {transform_indices = @transform_5, window_bounds = array<i64: 16, 2>}]} {
    %c0 = arith.constant 0 : index
    %c0_0 = arith.constant 0 : index
    %0 = vector.load %arg1[%c0, %c0_0] : memref<16x75xbf16, #tpu.memory_space<vmem>>, vector<16x75xbf16>
    %c0_1 = arith.constant 0 : index
    %c0_2 = arith.constant 0 : index
    %1 = vector.load %arg2[%c0_1, %c0_2] : memref<75x128xbf16, #tpu.memory_space<vmem>>, vector<75x128xbf16>
    %cst = arith.constant dense<0.000000e+00> : vector<16x128xf32>
    %2 = tpu.matmul %0, %1, %cst {dimension_numbers = #tpu.dot_dimension_numbers<[1], [0], [0], [1], [0, 0, 1, 1], [], []>} : vector<16x75xbf16>, vector<75x128xbf16>, vector<16x128xf32> -> vector<16x128xf32>
    %c0_3 = arith.constant 0 : index
    %c0_4 = arith.constant 0 : index
    %3 = vector.load %arg3[%c0_3, %c0_4] : memref<1x128xf32, #tpu.memory_space<vmem>>, vector<1x128xf32>
    %4 = vector.broadcast %3 : vector<1x128xf32> to vector<16x128xf32>
    %5 = arith.addf %2, %4 : vector<16x128xf32>
    %cst_5 = arith.constant 0.000000e+00 : f32
    %6 = vector.broadcast %cst_5 : f32 to vector<16x128xf32>
    %7 = arith.cmpf oge, %5, %6 : vector<16x128xf32>
    %cst_6 = arith.constant 0.00999999977 : f32
    %8 = vector.broadcast %cst_6 : f32 to vector<16x128xf32>
    %9 = arith.mulf %8, %5 : vector<16x128xf32>
    %10 = arith.select %7, %5, %9 : vector<16x128xi1>, vector<16x128xf32>
    %11 = arith.truncf %10 : vector<16x128xf32> to vector<16x128xbf16>
    %c0_7 = arith.constant 0 : index
    %c0_8 = arith.constant 0 : index
    %12 = vector.load %arg4[%c0_7, %c0_8] : memref<128x2xbf16, #tpu.memory_space<vmem>>, vector<128x2xbf16>
    %cst_9 = arith.constant dense<0.000000e+00> : vector<16x2xf32>
    %13 = tpu.matmul %11, %12, %cst_9 {dimension_numbers = #tpu.dot_dimension_numbers<[1], [0], [0], [1], [0, 0, 1, 1], [], []>} : vector<16x128xbf16>, vector<128x2xbf16>, vector<16x2xf32> -> vector<16x2xf32>
    %c0_10 = arith.constant 0 : index
    %c0_11 = arith.constant 0 : index
    %14 = vector.load %arg5[%c0_10, %c0_11] : memref<1x2xf32, #tpu.memory_space<vmem>>, vector<1x2xf32>
    %15 = vector.broadcast %14 : vector<1x2xf32> to vector<16x2xf32>
    %16 = arith.addf %13, %15 : vector<16x2xf32>
    %c0_12 = arith.constant 0 : index
    %c0_13 = arith.constant 0 : index
    %17 = vector.load %arg6[%c0_12, %c0_13] : memref<16x2xf32, #tpu.memory_space<vmem>>, vector<16x2xf32>
    tpu.vector_store %arg6[%c0_12, %c0_13], %16 {strides = array<i32>} : memref<16x2xf32, #tpu.memory_space<vmem>>, vector<16x2xf32>,
    return
  }
  func.func @transform_0(%arg0: i32) -> (i32, i32) {
    %c0_i32 = arith.constant 0 : i32
    %c0_i32_0 = arith.constant 0 : i32
    return %arg0, %c0_i32 : i32, i32
  }
  func.func @transform_1(%arg0: i32) -> (i32, i32) {
    %c0_i32 = arith.constant 0 : i32
    %c0_i32_0 = arith.constant 0 : i32
    %c0_i32_1 = arith.constant 0 : i32
    return %c0_i32, %c0_i32_0 : i32, i32
  }
  func.func @transform_2(%arg0: i32) -> (i32, i32) {
    %c0_i32 = arith.constant 0 : i32
    %c0_i32_0 = arith.constant 0 : i32
    %c0_i32_1 = arith.constant 0 : i32
    return %c0_i32, %c0_i32_0 : i32, i32
  }
  func.func @transform_3(%arg0: i32) -> (i32, i32) {
    %c0_i32 = arith.constant 0 : i32
    %c0_i32_0 = arith.constant 0 : i32
    %c0_i32_1 = arith.constant 0 : i32
    return %c0_i32, %c0_i32_0 : i32, i32
  }
  func.func @transform_4(%arg0: i32) -> (i32, i32) {
    %c0_i32 = arith.constant 0 : i32
    %c0_i32_0 = arith.constant 0 : i32
    %c0_i32_1 = arith.constant 0 : i32
    return %c0_i32, %c0_i32_0 : i32, i32
  }
  func.func @transform_5(%arg0: i32) -> (i32, i32) {
    %c0_i32 = arith.constant 0 : i32
    %c0_i32_0 = arith.constant 0 : i32
    return %arg0, %c0_i32 : i32, i32
  }
}

</mosaic_0001>

<bundles_post_ra>
// kernel: tpu_custom_call.1
= control target key start
LH: loop header
LB: loop body
LE: loop exit
PB: predicated region body
PF: predicated region fallthrough
CT: control target
= control target key end

     0   :  { %vm75_vm0 = vcmask 1044480   ;;  %vm76_vm1 = vcmask 1045504   ;;  %v266_v2 = vmov 65535   ;;  %vm71_vm2 = vcmask 613376   ;;  %s354_s1 = inlined_call_operand.vmem [shape: bf16[75,128], index: 1, kind: input, shape index: {}]   ;;  %s355_s3 = inlined_call_operand.vmem [shape: bf16[128,2], index: 3, kind: input, shape index: {}]   ;;  %s356_s2 = inlined_call_operand.vmem [shape: f32[1,128], index: 2, kind: input, shape index: {}]   ;;  %s357_s0 = inlined_call_operand.vmem [shape: bf16[16,75], index: 0, kind: input, shape index: {}]   ;;  %s358_s4 = inlined_call_operand.vmem [shape: f32[1,2], index: 4, kind: input, shape index: {}]   ;;  %s359_s5 = inlined_call_operand.vmem [shape: f32[16,2], index: 5, kind: output, shape index: {}]  }
   0x1   :  { %v214_v0 = vld [vmem:[%s354_s1 + $0x20] sm:$0xf]  ;;  %v254_v1 = vld [vmem:[%s354_s1 + $0x20] sm:$0x30]  ;;  %v77_v3 = vsel %vm75_vm0, 4294967295, %v266_v2  ;;  %v262_v6 = vld [vmem:[%s355_s3 + $0x38] sm:$0xff] }
   0x2   :  { %v215_v4 = vor.u32 %v254_v1, %v214_v0  ;;  %v78_v5 = vsel %vm76_vm1, %v77_v3, 0  ;;  %171 = vmatpush.bf16.msra.mxu1 %v262_v6  ;;  %v261_v8 = vld [vmem:[%s355_s3 + $0x30] sm:$0xff]  ;;  %v253_v9 = vld [vmem:[%s354_s1 + $0x18] sm:$0xff]  ;;  %v260_v10 = vld [vmem:[%s355_s3 + $0x28] sm:$0xff]  ;;  %vm185_vm5 = vcmask 15360  }
   0x3   :  { %v252_v11 = vld [vmem:[%s354_s1 + $0x10] sm:$0xff]  ;;  %v259_v12 = vld [vmem:[%s355_s3 + $0x20] sm:$0xff]  ;;  %v251_v13 = vld [vmem:[%s354_s1 + $0x8] sm:$0xff] }
   0x4   :  { %v80_v7 = vand.u32 %v215_v4, %v78_v5  ;;  %v250_v14 = vld [vmem:[%s354_s1] sm:$0xff]  ;;  %v258_v16 = vld [vmem:[%s355_s3 + $0x18] sm:$0xff]  ;;  %v257_v17 = vld [vmem:[%s355_s3 + $0x10] sm:$0xff] }
   0x5   :  { %v249_v15 = vld [vmem:[%s357_s0] sm:$0xff]  ;;  %v256_v18 = vld [vmem:[%s355_s3 + $0x8] sm:$0xff] }
   0x6   :  { %85 = vmatpush.bf16.msra.mxu0 %v80_v7  ;;  %172 = vmatpush.bf16.msra.mxu1 %v261_v8  ;;  %v255_v19 = vld [vmem:[%s355_s3] sm:$0xff] }
   0x7   :  { %v264_v21 = vld [vmem:[%s356_s2] ss:$0 sm:$0xff] }
   0x8   :  { %v265_v30 = vld [vmem:[%s358_s4] ss:$0 sm:$0xff] }
   0xa   :  { %86 = vmatpush.bf16.msra.mxu0 %v253_v9  ;;  %173 = vmatpush.bf16.msra.mxu1 %v260_v10 }
   0xe   :  { %87 = vmatpush.bf16.msra.mxu0 %v252_v11  ;;  %174 = vmatpush.bf16.msra.mxu1 %v259_v12 }
  0x12   :  { %88 = vmatpush.bf16.msra.mxu0 %v251_v13  ;;  %175 = vmatpush.bf16.msra.mxu1 %v258_v16 }
  0x16   :  { %89 = vmatpush.bf16.msra.mxu0 %v250_v14  ;;  %176 = vmatpush.bf16.msra.mxu1 %v257_v17 }
  0x19   :  { %216 = vmatmul.msk.bf16.vlgmr.msra.gmra.mxu0 %vm71_vm2, %v249_v15 }
  0x1a   :  { %177 = vmatpush.bf16.msra.mxu1 %v256_v18 }
  0x1e   :  { %178 = vmatpush.bf16.msra.mxu1 %v255_v19 }
  0x96   :  { %v91_v20 = vpop.f32.mrf.mxu0 }
  0x97   :  { %v92_v22 = vadd.f32 %v264_v21, %v91_v20 }
  0x99   :  { %v98_v24 = vmul.f32 0.01, %v92_v22  ;;  %vm96_vm3 = vcmp.ge.f32.partialorder %v92_v22, 0.0 }
  0x9b   :  { %v100_v27 = vsel %vm96_vm3, %v92_v22, %v98_v24 }
  0x9e   :  { %v93_v23 = vpop.f32.mrf.mxu0 }
  0x9f   :  { %v94_v25 = vadd.f32 %v264_v21, %v93_v23 }
  0xa1   :  { %v99_v26 = vmul.f32 0.01, %v94_v25  ;;  %vm97_vm4 = vcmp.ge.f32.partialorder %v94_v25, 0.0 }
  0xa3   :  { %v101_v28 = vsel %vm97_vm4, %v94_v25, %v99_v26 }
  0xa4   :  { %v102_v29 = vpack.c.bf16 %v101_v28, %v100_v27 }
  0xa6   :  { %179 = vmatmul.bf16.vlgmr.msra.gmra.mxu1 %v102_v29 }
 0x123   :  { %v180_v31 = vpop.f32.mrf.mxu1 }
 0x124   :  { %v181_v32 = vadd.f32 %v265_v30, %v180_v31 }
 0x126   :  { %186 = vst.msk [vmem:[%s359_s5] sm:$0xff] %vm185_vm5, %v181_v32 }
 0x12b   :  { %v182_v33 = vpop.f32.mrf.mxu1 }
 0x12c   :  { %v183_v34 = vadd.f32 %v265_v30, %v182_v33 }
 0x12e   :  { %187 = vst.msk [vmem:[%s359_s5 + $0x8] sm:$0xff] %vm185_vm5, %v183_v34 }

</bundles_post_ra>
